<compile_context>
chip_gen: v6e
topology: v6e:2x2x1
jax: 0.10.0
libtpu: 0.0.40
codegen_flags: <defaults>
</compile_context>

<pallas_src>
import functools

import jax
import jax.numpy as jnp
from jax import lax
from jax.experimental import pallas as pl
from jax.experimental.pallas import tpu as pltpu

_LANES = 128
_SUBLANES = 8
_MAX_BLOCK_ROWS = 1024  # 1024x128 f32 = 512 KiB/tile; 2 inputs x 2 buffers = 2 MiB


def _cdiv(a, b):
    return -(-a // b)


def _round_up(a, b):
    return _cdiv(a, b) * b


def _focal_loss_kernel(x_ref, t_ref, o_ref, acc_ref, *,
                       gamma, n, block_rows, steps_per_shard):
    s = pl.program_id(0)   # TensorCore shard (parallel)
    i = pl.program_id(1)   # reduction step within shard (arbitrary)

    @pl.when(i == 0)
    def _():
        acc_ref[...] = jnp.zeros_like(acc_ref)

    x = x_ref[...].astype(jnp.float32)
    t = t_ref[...].astype(jnp.float32)

    # Stable log-sigmoid: log(p) = min(x,0) - log(1+exp(-|x|)),
    #                     log(1-p) = -max(x,0) - log(1+exp(-|x|)).
    # (exp/log shared between the two terms -> ~3 EUP ops per element.)
    z = jnp.log(1.0 + jnp.exp(-jnp.abs(x)))
    log_p = jnp.minimum(x, 0.0) - z
    log_1mp = -jnp.maximum(x, 0.0) - z
    p = jnp.exp(log_p)
    one_m_p = 1.0 - p

    g = float(gamma)
    if g.is_integer():
        gi = int(g)
        w_pos = lax.integer_pow(one_m_p, gi)   # plain multiplies on the VPU
        w_neg = lax.integer_pow(p, gi)
    else:
        w_pos = one_m_p ** g
        w_neg = p ** g

    loss = -w_pos * t * log_p - w_neg * (1.0 - t) * log_1mp

    # Mask the padded tail in-kernel (no mask array streamed from HBM).
    block_idx = s * steps_per_shard + i
    row = lax.broadcasted_iota(jnp.int32, (block_rows, _LANES), 0)
    col = lax.broadcasted_iota(jnp.int32, (block_rows, _LANES), 1)
    gidx = (block_idx * block_rows + row) * _LANES + col  # fits int32 for n < 2^31
    loss = jnp.where(gidx < n, loss, 0.0)

    # Reduce the big tile to an (8,128) partial sum via layout-preserving
    # reshape + vreg-wise adds; keeps the accumulator tiny.
    acc_ref[...] += jnp.sum(
        loss.reshape(block_rows // _SUBLANES, _SUBLANES, _LANES), axis=0)

    @pl.when(i == pl.num_programs(1) - 1)
    def _():
        o_ref[0] = acc_ref[...]


def focal_loss2(inputs, targets, gamma=2):
    """JAX/Pallas equivalent of FocalLoss2.forward (returns scalar f32 mean loss)."""
    assert inputs.shape == targets.shape
    n = inputs.size

    x = jnp.ravel(inputs)   # keep original dtype; cast to f32 inside the kernel
    t = jnp.ravel(targets)

    rows_needed = max(_cdiv(n, _LANES), 1)
    block_rows = min(_MAX_BLOCK_ROWS, _round_up(rows_needed, _SUBLANES))
    total_blocks = _cdiv(rows_needed, block_rows)
    nsplit = 2 if total_blocks >= 2 else 1        # shard across 2 TCs on v7x
    steps = _cdiv(total_blocks, nsplit)
    padded_rows = nsplit * steps * block_rows

    pad = padded_rows * _LANES - n
    if pad:
        x = jnp.pad(x, (0, pad))
        t = jnp.pad(t, (0, pad))
    x2 = x.reshape(padded_rows, _LANES)
    t2 = t.reshape(padded_rows, _LANES)

    blk = pl.BlockSpec((block_rows, _LANES), lambda s, i: (s * steps + i, 0))

    partials = pl.pallas_call(
        functools.partial(_focal_loss_kernel, gamma=gamma, n=n,
                          block_rows=block_rows, steps_per_shard=steps),
        out_shape=jax.ShapeDtypeStruct((nsplit, _SUBLANES, _LANES), jnp.float32),
        grid_spec=pltpu.PrefetchScalarGridSpec(
            num_scalar_prefetch=0,
            grid=(nsplit, steps),
            in_specs=[blk, blk],
            out_specs=pl.BlockSpec((1, _SUBLANES, _LANES), lambda s, i: (s, 0, 0)),
            scratch_shapes=[pltpu.VMEM((_SUBLANES, _LANES), jnp.float32)],
        ),
        compiler_params=pltpu.CompilerParams(
            dimension_semantics=("parallel", "arbitrary")),
    )(x2, t2)

    # Single tiny cross-lane reduction + mean normalisation in the wrapper.
    return jnp.sum(partials) / jnp.float32(n)


def _reference(inputs, targets, gamma=2):
    p = jax.nn.sigmoid(inputs.astype(jnp.float32))
    t = targets.astype(jnp.float32)
    loss = (-(1.0 - p) ** gamma * t * jnp.log(p)
            - p ** gamma * (1.0 - t) * jnp.log(1.0 - p))
    return jnp.mean(loss)


if __name__ == "__main__":
    key = jax.random.PRNGKey(0)
    k1, k2 = jax.random.split(key)

    # NCHW logits and binary targets, small shapes.
    x = jax.random.normal(k1, (2, 4, 16, 16), dtype=jnp.float32)
    tgt = (jax.random.uniform(k2, (2, 4, 16, 16)) > 0.5).astype(jnp.float32)

    out = jax.block_until_ready(focal_loss2(x, tgt, gamma=2))
    ref = jax.block_until_ready(_reference(x, tgt, gamma=2))

    assert jnp.allclose(out, ref, rtol=1e-5, atol=1e-5), (out, ref)
    print("KERNEL_OK")
</pallas_src>

<mosaic_0001>
module attributes {stable_mosaic.version = 11 : i64} {
  func.func @_focal_loss_kernel(%arg0: i32, %arg1: i32, %arg2: memref<16x128xf32, #tpu.memory_space<vmem>>, %arg3: memref<16x128xf32, #tpu.memory_space<vmem>>, %arg4: memref<1x8x128xf32, #tpu.memory_space<vmem>>, %arg5: memref<8x128xf32, #tpu.memory_space<vmem>>) attributes {dimension_semantics = [#tpu.dimension_semantics<parallel>, #tpu.dimension_semantics<arbitrary>], iteration_bounds = array<i64: 1, 1>, scalar_prefetch = 0 : i64, scratch_operands = 1 : i64, tpu.core_type = #tpu.core_type<tc>, window_params = [{transform_indices = @transform_0, window_bounds = array<i64: 16, 128>}, {transform_indices = @transform_1, window_bounds = array<i64: 16, 128>}, {transform_indices = @transform_2, window_bounds = array<i64: 1, 8, 128>}]} {
    %c0_i32 = arith.constant 0 : i32
    %0 = arith.cmpi eq, %arg1, %c0_i32 : i32
    %1 = arith.extui %0 : i1 to i32
    %c0_i32_0 = arith.constant 0 : i32
    %2 = arith.cmpi ne, %1, %c0_i32_0 : i32
    scf.if %2 {
      %cst_19 = arith.constant 0.000000e+00 : f32
      %56 = vector.broadcast %cst_19 : f32 to vector<8x128xf32>
      %c0_20 = arith.constant 0 : index
      %c0_21 = arith.constant 0 : index
      %57 = vector.load %arg5[%c0_20, %c0_21] : memref<8x128xf32, #tpu.memory_space<vmem>>, vector<8x128xf32>
      tpu.vector_store %arg5[%c0_20, %c0_21], %56 {strides = array<i32>} : memref<8x128xf32, #tpu.memory_space<vmem>>, vector<8x128xf32>,
    } else {
    }
    %c0 = arith.constant 0 : index
    %c0_1 = arith.constant 0 : index
    %3 = vector.load %arg2[%c0, %c0_1] : memref<16x128xf32, #tpu.memory_space<vmem>>, vector<16x128xf32>
    %c0_2 = arith.constant 0 : index
    %c0_3 = arith.constant 0 : index
    %4 = vector.load %arg3[%c0_2, %c0_3] : memref<16x128xf32, #tpu.memory_space<vmem>>, vector<16x128xf32>
    %5 = math.absf %3 : vector<16x128xf32>
    %cst = arith.constant 0.000000e+00 : f32
    %6 = vector.broadcast %cst : f32 to vector<16x128xf32>
    %7 = arith.subf %6, %5 : vector<16x128xf32>
    %8 = math.exp %7 : vector<16x128xf32>
    %cst_4 = arith.constant 1.000000e+00 : f32
    %9 = vector.broadcast %cst_4 : f32 to vector<16x128xf32>
    %10 = arith.addf %9, %8 : vector<16x128xf32>
    %11 = math.log %10 : vector<16x128xf32>
    %cst_5 = arith.constant 0.000000e+00 : f32
    %12 = vector.broadcast %cst_5 : f32 to vector<16x128xf32>
    %13 = arith.minimumf %3, %12 : vector<16x128xf32>
    %14 = arith.subf %13, %11 : vector<16x128xf32>
    %cst_6 = arith.constant 0.000000e+00 : f32
    %15 = vector.broadcast %cst_6 : f32 to vector<16x128xf32>
    %16 = arith.maximumf %3, %15 : vector<16x128xf32>
    %cst_7 = arith.constant 0.000000e+00 : f32
    %17 = vector.broadcast %cst_7 : f32 to vector<16x128xf32>
    %18 = arith.subf %17, %16 : vector<16x128xf32>
    %19 = arith.subf %18, %11 : vector<16x128xf32>
    %20 = math.exp %14 : vector<16x128xf32>
    %cst_8 = arith.constant 1.000000e+00 : f32
    %21 = vector.broadcast %cst_8 : f32 to vector<16x128xf32>
    %22 = arith.subf %21, %20 : vector<16x128xf32>
    %23 = arith.mulf %22, %22 : vector<16x128xf32>
    %24 = arith.mulf %20, %20 : vector<16x128xf32>
    %cst_9 = arith.constant 0.000000e+00 : f32
    %25 = vector.broadcast %cst_9 : f32 to vector<16x128xf32>
    %26 = arith.subf %25, %23 : vector<16x128xf32>
    %27 = arith.mulf %26, %4 : vector<16x128xf32>
    %28 = arith.mulf %27, %14 : vector<16x128xf32>
    %cst_10 = arith.constant 1.000000e+00 : f32
    %29 = vector.broadcast %cst_10 : f32 to vector<16x128xf32>
    %30 = arith.subf %29, %4 : vector<16x128xf32>
    %31 = arith.mulf %24, %30 : vector<16x128xf32>
    %32 = arith.mulf %31, %19 : vector<16x128xf32>
    %33 = arith.subf %28, %32 : vector<16x128xf32>
    %c1_i32 = arith.constant 1 : i32
    %34 = arith.muli %arg0, %c1_i32 : i32
    %35 = arith.addi %34, %arg1 : i32
    %36 = tpu.iota {dimensions = array<i32: 0>} : vector<16x128xi32>
    %37 = tpu.iota {dimensions = array<i32: 1>} : vector<16x128xi32>
    %c16_i32 = arith.constant 16 : i32
    %38 = arith.muli %35, %c16_i32 : i32
    %39 = vector.broadcast %38 : i32 to vector<16x128xi32>
    %40 = arith.addi %39, %36 : vector<16x128xi32>
    %c128_i32 = arith.constant 128 : i32
    %41 = vector.broadcast %c128_i32 : i32 to vector<16x128xi32>
    %42 = arith.muli %40, %41 : vector<16x128xi32>
    %43 = arith.addi %42, %37 : vector<16x128xi32>
    %c2048_i32 = arith.constant 2048 : i32
    %44 = vector.broadcast %c2048_i32 : i32 to vector<16x128xi32>
    %45 = arith.cmpi slt, %43, %44 : vector<16x128xi32>
    %cst_11 = arith.constant 0.000000e+00 : f32
    %46 = vector.broadcast %cst_11 : f32 to vector<16x128xf32>
    %47 = arith.select %45, %33, %46 : vector<16x128xi1>, vector<16x128xf32>
    %c0_12 = arith.constant 0 : index
    %c0_13 = arith.constant 0 : index
    %48 = vector.load %arg5[%c0_12, %c0_13] : memref<8x128xf32, #tpu.memory_space<vmem>>, vector<8x128xf32>
    %49 = vector.shape_cast %47 : vector<16x128xf32> to vector<2x8x128xf32>
    %cst_14 = arith.constant dense<0.000000e+00> : vector<8x128xf32>
    %50 = vector.multi_reduction <add>, %49, %cst_14 [0] : vector<2x8x128xf32> to vector<8x128xf32>
    %51 = arith.addf %48, %50 : vector<8x128xf32>
    %c0_15 = arith.constant 0 : index
    %c0_16 = arith.constant 0 : index
    %52 = vector.load %arg5[%c0_15, %c0_16] : memref<8x128xf32, #tpu.memory_space<vmem>>, vector<8x128xf32>
    tpu.vector_store %arg5[%c0_15, %c0_16], %51 {strides = array<i32>} : memref<8x128xf32, #tpu.memory_space<vmem>>, vector<8x128xf32>,
    %c0_i32_17 = arith.constant 0 : i32
    %53 = arith.cmpi eq, %arg1, %c0_i32_17 : i32
    %54 = arith.extui %53 : i1 to i32
    %c0_i32_18 = arith.constant 0 : i32
    %55 = arith.cmpi ne, %54, %c0_i32_18 : i32
    scf.if %55 {
      %c0_19 = arith.constant 0 : index
      %c0_20 = arith.constant 0 : index
      %56 = vector.load %arg5[%c0_19, %c0_20] : memref<8x128xf32, #tpu.memory_space<vmem>>, vector<8x128xf32>
      %c0_21 = arith.constant 0 : index
      %c0_22 = arith.constant 0 : index
      %c0_23 = arith.constant 0 : index
      %57 = vector.load %arg4[%c0_21, %c0_22, %c0_23] : memref<1x8x128xf32, #tpu.memory_space<vmem>>, vector<1x8x128xf32>
      %58 = vector.shape_cast %57 : vector<1x8x128xf32> to vector<8x128xf32>
      %59 = vector.shape_cast %56 : vector<8x128xf32> to vector<1x8x128xf32>
      tpu.vector_store %arg4[%c0_21, %c0_22, %c0_23], %59 {strides = array<i32>} : memref<1x8x128xf32, #tpu.memory_space<vmem>>, vector<1x8x128xf32>,
    } else {
    }
    return
  }
  func.func @transform_0(%arg0: i32, %arg1: i32) -> (i32, i32) {
    %c1_i32 = arith.constant 1 : i32
    %0 = arith.muli %arg0, %c1_i32 : i32
    %1 = arith.addi %0, %arg1 : i32
    %c0_i32 = arith.constant 0 : i32
    %c0_i32_0 = arith.constant 0 : i32
    return %1, %c0_i32 : i32, i32
  }
  func.func @transform_1(%arg0: i32, %arg1: i32) -> (i32, i32) {
    %c1_i32 = arith.constant 1 : i32
    %0 = arith.muli %arg0, %c1_i32 : i32
    %1 = arith.addi %0, %arg1 : i32
    %c0_i32 = arith.constant 0 : i32
    %c0_i32_0 = arith.constant 0 : i32
    return %1, %c0_i32 : i32, i32
  }
  func.func @transform_2(%arg0: i32, %arg1: i32) -> (i32, i32, i32) {
    %c0_i32 = arith.constant 0 : i32
    %c0_i32_0 = arith.constant 0 : i32
    %c0_i32_1 = arith.constant 0 : i32
    return %arg0, %c0_i32, %c0_i32_0 : i32, i32, i32
  }
}

</mosaic_0001>

<bundles_post_ra>
// kernel: tpu_custom_call.1
= control target key start
LH: loop header
LB: loop body
LE: loop exit
PB: predicated region body
PF: predicated region fallthrough
CT: control target
= control target key end

     0   :  { %7 = vsyncpa [#allocation4], 0  ;;  %s264_s0 = inlined_call_operand.hbm [shape: f32[16,128], index: 0, kind: input, shape index: {}]   ;;  %s265_s1 = inlined_call_operand.hbm [shape: f32[16,128], index: 1, kind: input, shape index: {}]   ;;  %s266_s2 = inlined_call_operand.hbm [shape: f32[1,8,128], index: 2, kind: output, shape index: {}]  }
   0x1   :  { %8 = vsyncpa [#allocation7], 0 }
   0x2   :  { %9 = vsyncpa [#allocation5], 0  ;;  %s235_s9 = smov [#allocation3]  }
   0x3   :  { %s19_s10 = sshll.u32 %s235_s9, 4  ;;  %s20_s10 = int_to_ptr.vmem [resolvable:$true] %s19_s10 }
   0x4   :  { %s177_s11 = scalar_lea.vmem %s20_s10, 256  ;;  %p182_p1 = scmp.lt.s32.totalorder %s20_s10, %s20_s10 }
   0x5   :  { %p178_p0 = scmp.ne.s32.totalorder %s20_s10, %s177_s11  ;;  %p183_p2 = scmp.lt.s32.totalorder %s177_s11, %s177_s11 }
   0x7   :  { %p184_p3 = por %p183_p2, %p182_p1 }
   0x9   :  { %p185_p4 = pnand %p184_p3, %p178_p0 }
   0xb   :  { %188 = shalt.err (!%p185_p4)
}
   0xc   :  { %s236_s12 = smov 128   ;;  %s237_s13 = smov 8  }
   0xd   :  { %25 = dma.hbm_to_vmem [thread:$0]  %s264_s0, 256, %s20_s10, [#allocation4], %s236_s12, %s236_s12, %s237_s13  }
   0xe   :  { %s238_s16 = smov [#allocation6]  }
   0xf   :  { %s35_s17 = sshll.u32 %s238_s16, 4  ;;  %s36_s17 = int_to_ptr.vmem [resolvable:$true] %s35_s17 }
  0x10   :  { %s197_s18 = scalar_lea.vmem %s36_s17, 256  ;;  %p202_p6 = scmp.lt.s32.totalorder %s36_s17, %s36_s17 }
  0x11   :  { %p198_p5 = scmp.ne.s32.totalorder %s36_s17, %s197_s18  ;;  %p203_p7 = scmp.lt.s32.totalorder %s197_s18, %s197_s18 }
  0x13   :  { %p204_p8 = por %p203_p7, %p202_p6 }
  0x15   :  { %p205_p9 = pnand %p204_p8, %p198_p5 }
  0x17   :  { %208 = shalt.err (!%p205_p9)
}
  0x18   :  { %41 = dma.hbm_to_vmem [thread:$0]  %s265_s1, 256, %s36_s17, [#allocation7], %s236_s12, %s236_s12, %s237_s13  }
  0x19   :  { %229 = dma.done.wait [#allocation4], 256  }
  0x1a   :  { %230 = vsyncadd [#allocation4], 4294967040 }
  0x1b   :  { %231 = dma.done.wait [#allocation7], 256  }
  0x1c   :  { %232 = vsyncadd [#allocation7], 4294967040  ;;  %v57_v0 = vld [vmem:[#allocation3] sm:$0xff]  ;;  %v58_v1 = vld [vmem:[#allocation3 + $0x8] sm:$0xff]  ;;  %v110_v22 = vlaneseq  ;;  %s239_s0 = smov [#allocation8]  }
  0x1d   :  { %v61_v2 = vand.u32 2147483647, %v57_v0  ;;  %v62_v3 = vand.u32 2147483647, %v58_v1  ;;  %v75_v12 = vmin.f32 %v57_v0, 0.0  ;;  %v76_v14 = vmin.f32 %v58_v1, 0.0 }
  0x1e   :  { %v79_v23 = vmax.f32 %v57_v0, 0.0  ;;  %v111_v24 = vshrl.u32 %v110_v22, 7  ;;  %v59_v25 = vld [vmem:[#allocation6] sm:$0xff]  ;;  %v80_v26 = vmax.f32 %v58_v1, 0.0  ;;  %v60_v27 = vld [vmem:[#allocation6 + $0x8] sm:$0xff]  ;;  %v114_v39 = vand.u32 127, %v110_v22 }
  0x1f   :  { %v63_v4 = vsub.f32 0.0, %v61_v2  ;;  %v64_v5 = vsub.f32 0.0, %v62_v3  ;;  %v101_v29 = vsub.f32 1.0, %v59_v25  ;;  %v102_v33 = vsub.f32 1.0, %v60_v27  ;;  %s142_s1 = sshll.u32 %s239_s0, 4  ;;  %s143_s1 = int_to_ptr.vmem [resolvable:$true] %s142_s1 }
  0x20   :  { %v81_v28 = vsub.f32 0.0, %v79_v23  ;;  %v112_v30 = vadd.s32 8, %v111_v24  ;;  %v82_v32 = vsub.f32 0.0, %v80_v26  ;;  %v119_v40 = vmul.u32 128, %v111_v24  ;;  %s209_s21 = scalar_lea.vmem %s143_s1, 128  ;;  %p214_p11 = scmp.lt.s32.totalorder %s143_s1, %s143_s1 }
  0x21   :  { %v65_v6 = vmul.f32 1.442695, %v63_v4  ;;  %v67_v7 = vmul.f32 1.442695, %v64_v5  ;;  %p210_p10 = scmp.ne.s32.totalorder %s143_s1, %s209_s21  ;;  %p215_p12 = scmp.lt.s32.totalorder %s209_s21, %s209_s21 }
  0x22   :  { %v120_v44 = vmul.u32 128, %v112_v30  ;;  %v121_v50 = vadd.s32 %v119_v40, %v114_v39 }
  0x23   :  { %157 = vpow2.f32 %v65_v6  ;;  %p216_p13 = por %p215_p12, %p214_p11 }
  0x24   :  { %159 = vpow2.f32 %v67_v7  ;;  %v122_v53 = vadd.s32 %v120_v44, %v114_v39  ;;  %vm123_vm0 = vcmp.lt.s32.totalorder %v121_v50, 2048 }
  0x25   :  { %p217_p0 = pnand %p216_p13, %p210_p10 }
  0x26   :  { %vm124_vm1 = vcmp.lt.s32.totalorder %v122_v53, 2048 }
  0x30   :  { %v158_v8 = vpop.eup %157 }
  0x31   :  { %v160_v9 = vpop.eup %159  ;;  %v69_v10 = vadd.f32 1.0, %v158_v8 }
  0x32   :  { %v70_v11 = vadd.f32 1.0, %v160_v9 }
  0x33   :  { %161 = vlog2.f32 %v69_v10 }
  0x34   :  { %163 = vlog2.f32 %v70_v11 }
  0x40   :  { %v162_v13 = vpop.eup %161 }
  0x41   :  { %v164_v15 = vpop.eup %163  ;;  %v72_v16 = vmul.f32 0.6931472, %v162_v13 }
  0x42   :  { %v74_v17 = vmul.f32 0.6931472, %v164_v15 }
  0x43   :  { %v77_v18 = vsub.f32 %v75_v12, %v72_v16  ;;  %v83_v41 = vsub.f32 %v81_v28, %v72_v16 }
  0x44   :  { %v78_v19 = vsub.f32 %v76_v14, %v74_v17  ;;  %v84_v45 = vsub.f32 %v82_v32, %v74_v17 }
  0x45   :  { %v85_v20 = vmul.f32 1.442695, %v77_v18 }
  0x46   :  { %v87_v21 = vmul.f32 1.442695, %v78_v19 }
  0x47   :  { %165 = vpow2.f32 %v85_v20 }
  0x48   :  { %167 = vpow2.f32 %v87_v21 }
  0x54   :  { %v166_v31 = vpop.eup %165 }
  0x55   :  { %v168_v34 = vpop.eup %167  ;;  %v89_v35 = vsub.f32 1.0, %v166_v31  ;;  %v93_v36 = vmul.f32 %v166_v31, %v166_v31 }
  0x56   :  { %v90_v37 = vsub.f32 1.0, %v168_v34  ;;  %v94_v38 = vmul.f32 %v168_v34, %v168_v34 }
  0x57   :  { %v91_v42 = vmul.f32 %v89_v35, %v89_v35  ;;  %v103_v43 = vmul.f32 %v101_v29, %v93_v36 }
  0x58   :  { %v92_v46 = vmul.f32 %v90_v37, %v90_v37  ;;  %v104_v47 = vmul.f32 %v102_v33, %v94_v38 }
  0x59   :  { %v95_v48 = vsub.f32 0.0, %v91_v42  ;;  %v105_v52 = vmul.f32 %v103_v43, %v83_v41 }
  0x5a   :  { %v96_v49 = vsub.f32 0.0, %v92_v46  ;;  %v106_v55 = vmul.f32 %v104_v47, %v84_v45 }
  0x5b   :  { %v97_v51 = vmul.f32 %v95_v48, %v59_v25 }
  0x5c   :  { %v98_v54 = vmul.f32 %v96_v49, %v60_v27 }
  0x5d   :  { %v99_v56 = vmul.f32 %v97_v51, %v77_v18 }
  0x5e   :  { %v100_v57 = vmul.f32 %v98_v54, %v78_v19 }
  0x5f   :  { %v107_v58 = vsub.f32 %v99_v56, %v105_v52 }
  0x60   :  { %v108_v59 = vsub.f32 %v100_v57, %v106_v55 }
  0x61   :  { %v125_v60 = vsel %vm123_vm0, %v107_v58, 0.0 }
  0x62   :  { %v126_v61 = vsel %vm124_vm1, %v108_v59, 0.0 }
  0x63   :  { %v128_v62 = vadd.f32 %v126_v61, %v125_v60 }
  0x65   :  { %135 = vst [vmem:[#allocation8] sm:$0xff] %v128_v62 }
  0x66   :  { %220 = shalt.err (!%p217_p0)
}
  0x67   :  { %145 = dma.vmem_to_hbm [thread:$0]  %s143_s1, 128, %s266_s2, [#allocation5]  }
  0x68   :  { %233 = dma.done.wait [#allocation5], 128  }
  0x69   :  { %234 = vsyncadd [#allocation5], 4294967168 }
  0x6a   :  { %149 = vsyncpa [#allocation4], 1 }
  0x6b   :  { %150 = vsyncpa [#allocation7], 1 }
  0x6c   :  { %151 = vsyncpa [#allocation5], 1 }

</bundles_post_ra>
